<compile_context>
chip_gen: v7x
topology: tpu7x:2x2x1
jax: 0.10.0
libtpu: 0.0.40
codegen_flags: <defaults>
</compile_context>

<pallas_src>
import numpy as np
import jax
import jax.numpy as jnp
from jax.experimental import pallas as pl
from jax.experimental.pallas import tpu as pltpu


# ---------------------------------------------------------------------------
# Host-side construction of the folded separable operators (no learned params)
# ---------------------------------------------------------------------------
def _bilinear_upsample_matrix(n_in: int, scale: int = 2) -> np.ndarray:
    """(n_out x n_in) matrix matching PyTorch bilinear, align_corners=False."""
    n_out = n_in * scale
    o = np.arange(n_out, dtype=np.float64)
    src = np.maximum((o + 0.5) / scale - 0.5, 0.0)     # PyTorch clamps src >= 0
    idx0 = np.floor(src).astype(np.int64)
    lam = src - idx0
    idx1 = np.minimum(idx0 + 1, n_in - 1)
    U = np.zeros((n_out, n_in), dtype=np.float64)
    U[np.arange(n_out), idx0] += 1.0 - lam
    U[np.arange(n_out), idx1] += lam
    return U


def _smooth_matrix(n: int) -> np.ndarray:
    """(n x n) matrix = replication pad(1) + 1D FIR [1,2,1]/4 along one axis."""
    v = np.array([1.0, 2.0, 1.0], dtype=np.float64) / 4.0
    S = np.zeros((n, n), dtype=np.float64)
    for y in range(n):
        for d in range(3):
            S[y, int(np.clip(y - 1 + d, 0, n - 1))] += v[d]
    return S


def _build_operators(h: int, w: int):
    """Returns (Mh, Mw^T) as f32 arrays:  y = Mh @ x @ Mw^T."""
    mh = _smooth_matrix(2 * h) @ _bilinear_upsample_matrix(h)      # (2H, H)
    mw = _smooth_matrix(2 * w) @ _bilinear_upsample_matrix(w)      # (2W, W)
    return (jnp.asarray(mh, dtype=jnp.float32),
            jnp.asarray(mw.T, dtype=jnp.float32))                  # (W, 2W)


# ---------------------------------------------------------------------------
# Fused Pallas kernel: one block of Bt planes per grid step, both passes in VMEM
# ---------------------------------------------------------------------------
def _make_kernel(bt: int):
    def kernel(mh_ref, mwt_ref, x_ref, o_ref):
        mh = mh_ref[...]            # (2H, H)   resident, single-buffered
        mwt = mwt_ref[...]          # (W, 2W)   resident, single-buffered
        # Per-plane 2D matmuls: no in-kernel transposes/reshapes, output lands
        # directly in NCHW.  bt is small and static, so this unrolls cleanly.
        for b in range(bt):
            xb = x_ref[b]                                            # (H, W)
            t = jnp.dot(xb, mwt, preferred_element_type=jnp.float32)  # (H, 2W)
            yb = jnp.dot(mh, t, preferred_element_type=jnp.float32)   # (2H, 2W)
            o_ref[b] = yb.astype(o_ref.dtype)
    return kernel


# ---------------------------------------------------------------------------
# Tiling / VMEM heuristics
# ---------------------------------------------------------------------------
_PLANE_BLOCK_BUDGET = 24 << 20     # keep plane blocks comfortably inside v7x VMEM
_MAX_BT = 16                       # cap unroll length / compile time


def _choose_bt(bc: int, h: int, w: int) -> int:
    """Planes per grid step: largest divisor of BC within the VMEM budget,
    reduced if needed so the grid has >= 2 parallel steps (v7x megacore)."""
    # per-plane f32 bytes: in (x2 double-buffer) + out (x2) + width-pass temp
    per_plane = (2 * h * w + 2 * 4 * h * w + 2 * 2 * h * w) * 4
    cap = max(1, min(_MAX_BT, _PLANE_BLOCK_BUDGET // max(per_plane, 1)))
    bt = 1
    for d in range(1, cap + 1):
        if bc % d == 0:
            bt = d
    if bc >= 2 and bc // bt < 2:
        for d in range(bt, 0, -1):
            if bc % d == 0 and bc // d >= 2:
                bt = d
                break
    return bt


def _physical_vmem_bytes() -> int:
    try:
        return int(pltpu.get_tpu_info().vmem_capacity_bytes)
    except Exception:
        return 64 << 20            # conservative: v7x per-TensorCore VMEM


def _vmem_limit_bytes(bt: int, h: int, w: int) -> int:
    op = (2 * h * h + 2 * w * w) * 4                    # Mh + Mw^T, single-buffered
    blocks = bt * (2 * h * w + 2 * 4 * h * w) * 4       # in/out blocks, double-buffered
    tmp = bt * 2 * h * w * 4                            # width-pass temporaries (upper bound)
    need = op + blocks + tmp
    limit = int(need * 1.5) + (8 << 20)                 # headroom for compiler scratch
    limit = max(limit, 32 << 20)
    return min(limit, int(_physical_vmem_bytes() * 0.9))


def _resident_operator_spec(shape):
    """Constant-index resident operator; single-buffered when supported."""
    idx = lambda i: (0,) * len(shape)
    try:
        return pl.BlockSpec(shape, idx, pipeline_mode=pl.Buffered(1))
    except TypeError:                                   # older BlockSpec signature
        return pl.BlockSpec(shape, idx)


# ---------------------------------------------------------------------------
# Wrapper: single fused pallas_call, no XLA transposes (reshapes are free)
# ---------------------------------------------------------------------------
def upsample_smooth(x: jax.Array) -> jax.Array:
    """x: (B, C, H, W)  ->  (B, C, 2H, 2W)   (PyTorch Upsample(2x bilinear)+Smooth)"""
    b, c, h, w = x.shape
    bc = b * c
    mh, mwt = _build_operators(h, w)                    # (2H,H), (W,2W)

    xf = x.reshape(bc, h, w).astype(jnp.float32)        # layout-preserving reshape

    bt = _choose_bt(bc, h, w)
    grid = (bc // bt,)

    flops = bc * (4 * h * w * w + 8 * h * h * w)        # width + height matmuls
    bytes_accessed = 4 * (bc * h * w + bc * 4 * h * w + 2 * h * h + 2 * w * w)
    cost = pl.CostEstimate(flops=flops, transcendentals=0,
                           bytes_accessed=bytes_accessed)

    out = pl.pallas_call(
        _make_kernel(bt),
        out_shape=jax.ShapeDtypeStruct((bc, 2 * h, 2 * w), jnp.float32),
        grid_spec=pltpu.PrefetchScalarGridSpec(
            num_scalar_prefetch=0,
            grid=grid,
            in_specs=[
                _resident_operator_spec((2 * h, h)),                 # Mh   (resident)
                _resident_operator_spec((w, 2 * w)),                 # Mw^T (resident)
                pl.BlockSpec((bt, h, w), lambda i: (i, 0, 0)),       # plane batch in
            ],
            out_specs=pl.BlockSpec((bt, 2 * h, 2 * w), lambda i: (i, 0, 0)),
        ),
        compiler_params=pltpu.CompilerParams(
            dimension_semantics=("parallel",),
            vmem_limit_bytes=_vmem_limit_bytes(bt, h, w)),
        cost_estimate=cost,
    )(mh, mwt, xf)

    return out.reshape(b, c, 2 * h, 2 * w).astype(x.dtype)


# ---------------------------------------------------------------------------
# Pure-JAX reference (same math, no Pallas) for a sanity check
# ---------------------------------------------------------------------------
def _reference(x: jax.Array) -> jax.Array:
    b, c, h, w = x.shape
    mh, mwt = _build_operators(h, w)
    xf = x.reshape(b * c, h, w).astype(jnp.float32)
    out = jnp.einsum("oh,nhw,wk->nok", mh, xf, mwt)
    return out.reshape(b, c, 2 * h, 2 * w).astype(x.dtype)


if __name__ == "__main__":
    key = jax.random.PRNGKey(0)
    x = jax.random.normal(key, (2, 4, 16, 16), dtype=jnp.float32)

    y = jax.jit(upsample_smooth)(x)
    y = jax.block_until_ready(y)

    assert y.shape == (2, 4, 32, 32), y.shape
    y_ref = jax.block_until_ready(_reference(x))
    np.testing.assert_allclose(np.asarray(y), np.asarray(y_ref),
                               rtol=1e-5, atol=1e-5)
    print("KERNEL_OK")
</pallas_src>

<mosaic_0001>
module attributes {stable_mosaic.version = 11 : i64} {
  func.func @kernel(%arg0: i32, %arg1: memref<32x16xf32, #tpu.memory_space<vmem>>, %arg2: memref<16x32xf32, #tpu.memory_space<vmem>>, %arg3: memref<4x16x16xf32, #tpu.memory_space<vmem>>, %arg4: memref<4x32x32xf32, #tpu.memory_space<vmem>>) attributes {dimension_semantics = [#tpu.dimension_semantics<parallel>], iteration_bounds = array<i64: 2>, scalar_prefetch = 0 : i64, scratch_operands = 0 : i64, tpu.core_type = #tpu.core_type<tc>, window_params = [{pipeline_mode = #tpu.pipeline_mode<synchronous>, transform_indices = @transform_0, window_bounds = array<i64: 32, 16>}, {pipeline_mode = #tpu.pipeline_mode<synchronous>, transform_indices = @transform_1, window_bounds = array<i64: 16, 32>}, {transform_indices = @transform_2, window_bounds = array<i64: 4, 16, 16>}, {transform_indices = @transform_3, window_bounds = array<i64: 4, 32, 32>}]} {
    %c0 = arith.constant 0 : index
    %c0_0 = arith.constant 0 : index
    %0 = vector.load %arg1[%c0, %c0_0] : memref<32x16xf32, #tpu.memory_space<vmem>>, vector<32x16xf32>
    %c0_1 = arith.constant 0 : index
    %c0_2 = arith.constant 0 : index
    %1 = vector.load %arg2[%c0_1, %c0_2] : memref<16x32xf32, #tpu.memory_space<vmem>>, vector<16x32xf32>
    %c0_3 = arith.constant 0 : index
    %c0_4 = arith.constant 0 : index
    %c0_5 = arith.constant 0 : index
    %2 = vector.load %arg3[%c0_3, %c0_4, %c0_5] : memref<4x16x16xf32, #tpu.memory_space<vmem>>, vector<1x16x16xf32>
    %3 = vector.shape_cast %2 : vector<1x16x16xf32> to vector<16x16xf32>
    %cst = arith.constant dense<0.000000e+00> : vector<16x32xf32>
    %4 = tpu.matmul %3, %1, %cst {dimension_numbers = #tpu.dot_dimension_numbers<[1], [0], [0], [1], [0, 0, 1, 1], [], []>} : vector<16x16xf32>, vector<16x32xf32>, vector<16x32xf32> -> vector<16x32xf32>
    %cst_6 = arith.constant dense<0.000000e+00> : vector<32x32xf32>
    %5 = tpu.matmul %0, %4, %cst_6 {dimension_numbers = #tpu.dot_dimension_numbers<[1], [0], [0], [1], [0, 0, 1, 1], [], []>} : vector<32x16xf32>, vector<16x32xf32>, vector<32x32xf32> -> vector<32x32xf32>
    %c0_7 = arith.constant 0 : index
    %c0_8 = arith.constant 0 : index
    %c0_9 = arith.constant 0 : index
    %6 = vector.load %arg4[%c0_7, %c0_8, %c0_9] : memref<4x32x32xf32, #tpu.memory_space<vmem>>, vector<1x32x32xf32>
    %7 = vector.shape_cast %6 : vector<1x32x32xf32> to vector<32x32xf32>
    %8 = vector.shape_cast %5 : vector<32x32xf32> to vector<1x32x32xf32>
    tpu.vector_store %arg4[%c0_7, %c0_8, %c0_9], %8 {strides = array<i32>} : memref<4x32x32xf32, #tpu.memory_space<vmem>>, vector<1x32x32xf32>,
    %c1 = arith.constant 1 : index
    %c0_10 = arith.constant 0 : index
    %c0_11 = arith.constant 0 : index
    %9 = vector.load %arg3[%c1, %c0_10, %c0_11] : memref<4x16x16xf32, #tpu.memory_space<vmem>>, vector<1x16x16xf32>
    %10 = vector.shape_cast %9 : vector<1x16x16xf32> to vector<16x16xf32>
    %cst_12 = arith.constant dense<0.000000e+00> : vector<16x32xf32>
    %11 = tpu.matmul %10, %1, %cst_12 {dimension_numbers = #tpu.dot_dimension_numbers<[1], [0], [0], [1], [0, 0, 1, 1], [], []>} : vector<16x16xf32>, vector<16x32xf32>, vector<16x32xf32> -> vector<16x32xf32>
    %cst_13 = arith.constant dense<0.000000e+00> : vector<32x32xf32>
    %12 = tpu.matmul %0, %11, %cst_13 {dimension_numbers = #tpu.dot_dimension_numbers<[1], [0], [0], [1], [0, 0, 1, 1], [], []>} : vector<32x16xf32>, vector<16x32xf32>, vector<32x32xf32> -> vector<32x32xf32>
    %c1_14 = arith.constant 1 : index
    %c0_15 = arith.constant 0 : index
    %c0_16 = arith.constant 0 : index
    %13 = vector.load %arg4[%c1_14, %c0_15, %c0_16] : memref<4x32x32xf32, #tpu.memory_space<vmem>>, vector<1x32x32xf32>
    %14 = vector.shape_cast %13 : vector<1x32x32xf32> to vector<32x32xf32>
    %15 = vector.shape_cast %12 : vector<32x32xf32> to vector<1x32x32xf32>
    tpu.vector_store %arg4[%c1_14, %c0_15, %c0_16], %15 {strides = array<i32>} : memref<4x32x32xf32, #tpu.memory_space<vmem>>, vector<1x32x32xf32>,
    %c2 = arith.constant 2 : index
    %c0_17 = arith.constant 0 : index
    %c0_18 = arith.constant 0 : index
    %16 = vector.load %arg3[%c2, %c0_17, %c0_18] : memref<4x16x16xf32, #tpu.memory_space<vmem>>, vector<1x16x16xf32>
    %17 = vector.shape_cast %16 : vector<1x16x16xf32> to vector<16x16xf32>
    %cst_19 = arith.constant dense<0.000000e+00> : vector<16x32xf32>
    %18 = tpu.matmul %17, %1, %cst_19 {dimension_numbers = #tpu.dot_dimension_numbers<[1], [0], [0], [1], [0, 0, 1, 1], [], []>} : vector<16x16xf32>, vector<16x32xf32>, vector<16x32xf32> -> vector<16x32xf32>
    %cst_20 = arith.constant dense<0.000000e+00> : vector<32x32xf32>
    %19 = tpu.matmul %0, %18, %cst_20 {dimension_numbers = #tpu.dot_dimension_numbers<[1], [0], [0], [1], [0, 0, 1, 1], [], []>} : vector<32x16xf32>, vector<16x32xf32>, vector<32x32xf32> -> vector<32x32xf32>
    %c2_21 = arith.constant 2 : index
    %c0_22 = arith.constant 0 : index
    %c0_23 = arith.constant 0 : index
    %20 = vector.load %arg4[%c2_21, %c0_22, %c0_23] : memref<4x32x32xf32, #tpu.memory_space<vmem>>, vector<1x32x32xf32>
    %21 = vector.shape_cast %20 : vector<1x32x32xf32> to vector<32x32xf32>
    %22 = vector.shape_cast %19 : vector<32x32xf32> to vector<1x32x32xf32>
    tpu.vector_store %arg4[%c2_21, %c0_22, %c0_23], %22 {strides = array<i32>} : memref<4x32x32xf32, #tpu.memory_space<vmem>>, vector<1x32x32xf32>,
    %c3 = arith.constant 3 : index
    %c0_24 = arith.constant 0 : index
    %c0_25 = arith.constant 0 : index
    %23 = vector.load %arg3[%c3, %c0_24, %c0_25] : memref<4x16x16xf32, #tpu.memory_space<vmem>>, vector<1x16x16xf32>
    %24 = vector.shape_cast %23 : vector<1x16x16xf32> to vector<16x16xf32>
    %cst_26 = arith.constant dense<0.000000e+00> : vector<16x32xf32>
    %25 = tpu.matmul %24, %1, %cst_26 {dimension_numbers = #tpu.dot_dimension_numbers<[1], [0], [0], [1], [0, 0, 1, 1], [], []>} : vector<16x16xf32>, vector<16x32xf32>, vector<16x32xf32> -> vector<16x32xf32>
    %cst_27 = arith.constant dense<0.000000e+00> : vector<32x32xf32>
    %26 = tpu.matmul %0, %25, %cst_27 {dimension_numbers = #tpu.dot_dimension_numbers<[1], [0], [0], [1], [0, 0, 1, 1], [], []>} : vector<32x16xf32>, vector<16x32xf32>, vector<32x32xf32> -> vector<32x32xf32>
    %c3_28 = arith.constant 3 : index
    %c0_29 = arith.constant 0 : index
    %c0_30 = arith.constant 0 : index
    %27 = vector.load %arg4[%c3_28, %c0_29, %c0_30] : memref<4x32x32xf32, #tpu.memory_space<vmem>>, vector<1x32x32xf32>
    %28 = vector.shape_cast %27 : vector<1x32x32xf32> to vector<32x32xf32>
    %29 = vector.shape_cast %26 : vector<32x32xf32> to vector<1x32x32xf32>
    tpu.vector_store %arg4[%c3_28, %c0_29, %c0_30], %29 {strides = array<i32>} : memref<4x32x32xf32, #tpu.memory_space<vmem>>, vector<1x32x32xf32>,
    return
  }
  func.func @transform_0(%arg0: i32) -> (i32, i32) {
    %c0_i32 = arith.constant 0 : i32
    %c0_i32_0 = arith.constant 0 : i32
    %c0_i32_1 = arith.constant 0 : i32
    return %c0_i32, %c0_i32_0 : i32, i32
  }
  func.func @transform_1(%arg0: i32) -> (i32, i32) {
    %c0_i32 = arith.constant 0 : i32
    %c0_i32_0 = arith.constant 0 : i32
    %c0_i32_1 = arith.constant 0 : i32
    return %c0_i32, %c0_i32_0 : i32, i32
  }
  func.func @transform_2(%arg0: i32) -> (i32, i32, i32) {
    %c0_i32 = arith.constant 0 : i32
    %c0_i32_0 = arith.constant 0 : i32
    %c0_i32_1 = arith.constant 0 : i32
    return %arg0, %c0_i32, %c0_i32_0 : i32, i32, i32
  }
  func.func @transform_3(%arg0: i32) -> (i32, i32, i32) {
    %c0_i32 = arith.constant 0 : i32
    %c0_i32_0 = arith.constant 0 : i32
    %c0_i32_1 = arith.constant 0 : i32
    return %arg0, %c0_i32, %c0_i32_0 : i32, i32, i32
  }
}

</mosaic_0001>

<bundles_post_ra>
// kernel: upsample_smooth.1
= control target key start
LH: loop header
LB: loop body
LE: loop exit
PB: predicated region body
PF: predicated region fallthrough
CT: control target
= control target key end

     0   :  { %8 = vsyncpa [#allocation3], 0  ;;  %s1817_s0 = inlined_call_operand.hbm [shape: f32[32,16], index: 0, kind: input, shape index: {}]   ;;  %s1818_s1 = inlined_call_operand.hbm [shape: f32[16,32], index: 1, kind: input, shape index: {}]   ;;  %s1819_s2 = inlined_call_operand.hbm [shape: f32[8,16,16], index: 2, kind: input, shape index: {}]   ;;  %s1820_s3 = inlined_call_operand.hbm [shape: f32[8,32,32], index: 3, kind: output, shape index: {}]  }
   0x1   :  { %9 = vsyncpa [#allocation6], 0 }
   0x2   :  { %10 = vsyncpa [#allocation4], 0 }
   0x3   :  { %12 = vsyncpa [#allocation4 + $0x1], 0  ;;  %s1507_s12 = smov 0   ;;  %s1509_s13 = smov 0  }
   0x4   :  { %s1511_s14 = smov 0   ;;  %s1513_s15 = smov 0  }
   0x5 LB: > { %s1528_s16 = sadd.s32 4294967295, %s1477_s15   ;;  %s1040_s17 = sadd.s32 4294967294, %s1477_s15   ;;  %s1477_s15 = sphi %s1513_s15, %s1848_s15   ;;  %s1473_s14 = sphi %s1511_s14, %s1847_s14   ;;  %s1469_s13 = sphi %s1509_s13, %s1846_s13   ;;  %s1465_s12 = sphi %s1507_s12, %s1845_s12  }
   0x6   : > { %s1532_s18 = sadd.s32 1, %s1477_s15   ;;  %s67_s19 = sadd.s32 1, %s1473_s14 }
   0x7   : > { %s64_s20 = ssub.s32 %s1477_s15, %s1532_s18  ;;  %p74_p0 = scmp.ne.s32.totalorder %s1473_s14, %s1469_s13 }
   0x8   : > { %p65_p1 = scmp.eq.s32.totalorder %s64_s20, 0  ;;  %p75_p2 = scmp.eq.s32.totalorder %s1477_s15, 0 }
   0x9   : > { %p80_p3 = scmp.ne.s32.totalorder %s1469_s13, %s1465_s12  ;;  %p1821_p4 = scmp.eq.s32.totalorder %s1528_s16, 0 }
   0xa   : > { %s1544_s21 = scalar_select %p65_p1, %s1473_s14, %s67_s19  }
   0xb   : > { %p1546_p5 = por %p75_p2, %p74_p0  ;;  %p1552_p6 = por %p1821_p4, %p80_p3 }
   0xc   : > { %p104_p7 = scmp.eq.s32.totalorder %s1528_s16, 1  ;;  %p110_p8 = scmp.eq.s32.totalorder %s1040_s17, 1 }
   0xd   : > { %s1826_s22 = scalar_select %p1546_p5, 1, 0 }
   0xe   : > { %s1827_s23 = scalar_select %p1552_p6, 1, 0 }
   0xf   : > { %p1041_p9 = scmp.ge.s32.totalorder %s1477_s15, 1  ;;  %p117_p10 = scmp.lt.s32.totalorder %s1477_s15, 3 }
  0x10   : > { %p1559_p11 = por %p104_p7, %p74_p0  ;;  %p1563_p12 = por %p110_p8, %p80_p3 }
  0x11   : > { %p1567_p13 = pnand %p1041_p9, %p117_p10  ;;  %s1479_s27 = smov [#allocation2]  }
  0x12   : > { %s1828_s24 = scalar_select %p1559_p11, 1, 0 }
  0x13   : > { %s1829_s25 = scalar_select %p1563_p12, 1, 0 }
  0x14   : > { %s1830_s26 = scalar_select %p1567_p13, 1, 0 }
  0x15   : > { %p1258_p1 = pneg %p1567_p13  ;;  %s129_s28 = sshll.u32 %s1479_s27, 4  ;;  %s130_s28 = int_to_ptr.vmem [resolvable:$true] %s129_s28 }
  0x16   : > { %s1480_s30 = smov [#allocation5]   ;;  %s1317_s7 = scalar_lea.hbm %s1817_s0, 512 }
  0x17   : > { %p1575_p2 = pnand %p1258_p1, %p1821_p4  ;;  %s142_s4 = sshll.u32 %s1480_s30, 4  ;;  %s143_s4 = int_to_ptr.vmem [resolvable:$true] %s142_s4 }
  0x18   : > { %p1318_p7 = scmp.ne.s32.totalorder %s1817_s0, %s1317_s7  ;;  %p1324_p1 = scmp.lt.u32.totalorder %s1317_s7, %s1817_s0 }
  0x19   : > { %p1319_p8 = pneg %p1575_p2 }
  0x1b   : > { %p1320_p9 = pnand %p1319_p8, %p1318_p7 }
  0x1d   : > { %p1321_p10 = pneg %p1320_p9 }
  0x1f   : > { %p1326_p0 = pnand %p1324_p1, %p1321_p10 }
  0x21   : > { %1329 = shalt.err (!%p1326_p0)
}
  0x22   : > { %s1330_s17 = scalar_lea.vmem %s130_s28, 512  ;;  %p1338_p11 = scmp.lt.s32.totalorder %s130_s28, %s130_s28 }
  0x23   : > { %p1331_p4 = scmp.ne.s32.totalorder %s130_s28, %s1330_s17  ;;  %p1339_p6 = scmp.lt.s32.totalorder %s1330_s17, %s1330_s17 }
  0x25   : > { %p1333_p3 = pnand %p1331_p4, %p1319_p8  ;;  %p1340_p13 = por %p1339_p6, %p1338_p11 }
  0x27   : > { %p1334_p12 = pneg %p1333_p3 }
  0x29   : > { %p1341_p5 = pnand %p1340_p13, %p1334_p12 }
  0x2b   : > { %1344 = shalt.err (!%p1341_p5)
}
  0x2c   : > { %s1481_s19 = smov 128   ;;  %s1482_s20 = smov 8  }
  0x2d   : > { %1261 = dma.hbm_to_vmem [thread:$0]  (!%p1575_p2), %s1817_s0, 512, %s130_s28, [#allocation3], %s1481_s19, %s1481_s19, %s1482_s20  }
  0x2e   : > { %p1832_p4 = scmp.ne.s32.totalorder %s1826_s22, 0  ;;  %p1833_p0 = scmp.lt.s32.totalorder %s1477_s15, 2 }
  0x2f   : > { %s1345_s8 = scalar_lea.hbm %s1818_s1, 256 }
  0x30   : > { %p1610_p3 = pnand %p1833_p0, %p1832_p4  ;;  %p1346_p5 = scmp.ne.s32.totalorder %s1818_s1, %s1345_s8 }
  0x31   : > { %p1352_p12 = scmp.lt.u32.totalorder %s1345_s8, %s1818_s1 }
  0x32   : > { %s1834_s5 = scalar_select %p1610_p3, 1, 0 }
  0x33   : > { %p1348_p6 = pnand %p1346_p5, %p1319_p8 }
  0x35   : > { %p1349_p11 = pneg %p1348_p6 }
  0x37   : > { %p1354_p13 = pnand %p1352_p12, %p1349_p11 }
  0x39   : > { %1357 = shalt.err (!%p1354_p13)
}
  0x3a   : > { %s1358_s11 = scalar_lea.vmem %s143_s4, 256  ;;  %p1366_p1 = scmp.lt.s32.totalorder %s143_s4, %s143_s4 }
  0x3b   : > { %p1359_p7 = scmp.ne.s32.totalorder %s143_s4, %s1358_s11  ;;  %p1367_p4 = scmp.lt.s32.totalorder %s1358_s11, %s1358_s11 }
  0x3d   : > { %p1361_p9 = pnand %p1359_p7, %p1319_p8  ;;  %p1368_p0 = por %p1367_p4, %p1366_p1 }
  0x3f   : > { %p1362_p10 = pneg %p1361_p9 }
  0x41   : > { %p1369_p3 = pnand %p1368_p0, %p1362_p10 }
  0x43   : > { %1372 = shalt.err (!%p1369_p3)
}
  0x44   : > { %1264 = dma.hbm_to_vmem [thread:$0]  (!%p1575_p2), %s1818_s1, 256, %s143_s4, [#allocation6], %s1481_s19, %s1481_s19, %s1482_s20  }
  0x45   : > { %s156_s30 = sand.u32 1, %s1477_s15   ;;  %s158_s6 = sand.u32 1, %s1473_s14  }
  0x46   : > { %s1045_s7 = sshll.u32 %s158_s6, 6  ;;  %s1103_s8 = sshll.u32 %s1477_s15, 10 }
  0x47   : > { %s1643_s29 = scalar_lea.hbm %s1819_s2, %s1103_s8  ;;  %s160_s28 = scalar_lea.vmem [#allocation7], %s1045_s7 }
  0x48   : > { %s168_s22 = sshll.u32 %s160_s28, 4  ;;  %s1647_s11 = scalar_lea.sflag [#allocation3], %s156_s30  ;;  %s1645_s22 = int_to_ptr.vmem [resolvable:$true] %s168_s22 }
  0x49   : > { %s1373_s4 = scalar_lea.hbm %s1643_s29, 1024  ;;  %p1835_p8 = scmp.ne.s32.totalorder %s1834_s5, 0 }
  0x4a   : > { %p1374_p2 = scmp.ne.s32.totalorder %s1643_s29, %s1373_s4  ;;  %s1378_s6 = scalar_lea.hbm %s1819_s2, 2048 }
  0x4b   : > { %p1375_p3 = pneg %p1835_p8  ;;  %p1379_p11 = scmp.lt.u32.totalorder %s1643_s29, %s1819_s2 }
  0x4c   : > { %p1380_p12 = scmp.lt.u32.totalorder %s1378_s6, %s1373_s4  ;;  %p1382_p7 = scmp.lt.u32.totalorder %s1373_s4, %s1643_s29 }
  0x4d   : > { %p1376_p5 = pnand %p1375_p3, %p1374_p2 }
  0x4e   : > { %p1381_p13 = por %p1380_p12, %p1379_p11 }
  0x4f   : > { %p1377_p6 = pneg %p1376_p5 }
  0x50   : > { %p1383_p9 = por %p1382_p7, %p1381_p13 }
  0x52   : > { %p1384_p10 = pnand %p1383_p9, %p1377_p6 }
  0x54   : > { %1387 = shalt.err (!%p1384_p10)
}
  0x55   : > { %s1388_s30 = scalar_lea.vmem %s1645_s22, 1024  ;;  %s1483_s7 = smov [#allocation7]  }
  0x56   : > { %p1389_p1 = scmp.ne.s32.totalorder %s1645_s22, %s1388_s30  ;;  %s1393_s10 = sshll.u32 %s1483_s7, 4  ;;  %s1394_s10 = int_to_ptr.vmem [resolvable:$false] %s1393_s10 }
  0x57   : > { %s1395_s28 = scalar_lea.vmem %s1394_s10, 2048  ;;  %p1396_p2 = scmp.lt.s32.totalorder %s1645_s22, %s1394_s10 }
  0x58   : > { %p1391_p4 = pnand %p1389_p1, %p1375_p3  ;;  %p1397_p5 = scmp.lt.s32.totalorder %s1395_s28, %s1388_s30 }
  0x5a   : > { %p1392_p0 = pneg %p1391_p4  ;;  %p1398_p11 = por %p1397_p5, %p1396_p2 }
  0x5c   : > { %p1399_p12 = pnand %p1398_p11, %p1392_p0 }
  0x5e   : > { %1402 = shalt.err (!%p1399_p12)
}
  0x5f   : > { %1268 = dma.hbm_to_vmem [thread:$0]  (!%p1835_p8), %s1643_s29, 1024, %s1645_s22, %s1647_s11, %s1481_s19, %s1481_s19, %s1482_s20  }
  0x60   : > { %p1836_p3 = scmp.ne.s32.totalorder %s1830_s26, 0 }
  0x61   : > { %p1837_p6 = scmp.eq.s32.totalorder (!%p1836_p3), %s1528_s16, 0 }
  0x62   : > { %180 = sbr.rel (%p1836_p3) target bundleno = 799 (0x31f), region = 32 }
  0x69   : > { %1448 = dma.done.wait (%p1837_p6), [#allocation3], 512   ;;  %p1838_p13 = pmov %p1837_p6 }
  0x6a   : > { %p1839_p7 = pmov %p1837_p6 }
  0x6b   : > { %1450 = vsyncadd (%p1838_p13), [#allocation3], 4294966784 }
  0x6c   : > { %1452 = dma.done.wait (%p1839_p7), [#allocation6], 256   ;;  %p1840_p9 = pmov %p1837_p6 }
  0x6d   : > { %s190_s5 = sand.u32 1, %s1528_s16   ;;  %s1690_s19 = sand.u32 1, %s1469_s13  }
  0x6e   : > { %1454 = vsyncadd (%p1840_p9), [#allocation6], 4294967040  ;;  %s1052_s26 = sshll.u32 %s1690_s19, 6  ;;  %s191_s20 = scalar_lea.sflag [#allocation3], %s190_s5 }
  0x6f   : > { %s1693_s29 = scalar_lea.vmem [#allocation7], %s1052_s26  ;;  %p1841_p8 = scmp.ne.s32.totalorder %s1827_s23, 0 }
  0x71   : > { %1456 = dma.done.wait (%p1841_p8), %s191_s20, 1024  }
  0x72   : > { %1458 = vsyncadd (%p1841_p8), %s191_s20, 4294966272  ;;  %vm227_vm0 = vcmask 130048   ;;  %v223_v0 = vld [vmem:[#allocation5] sm:$0xff]  ;;  %v224_v1 = vld [vmem:[#allocation5 + $0x8] sm:$0xff]  ;;  %s1053_s23 = sshll.u32 %s1690_s19, 7  ;;  %vm406_vm1 = vcmask 261120  }
  0x73   : > { %v225_v2 = vld [vmem:[%s1693_s29] sm:$0xff]  ;;  %v1214_v3 = vpack.c.bf16 %v224_v1, %v223_v0  ;;  %v1060_v4 = vld [vmem:[%s1693_s29 + $0x10] sm:$0xff]  ;;  %v226_v5 = vld [vmem:[%s1693_s29 + $0x8] sm:$0xff]  ;;  %s1726_s22 = scalar_lea.vmem [#allocation8], %s1053_s23  ;;  %s1105_s11 = sshll.u32 %s1528_s16, 11 }
  0x74   : > { %1150 = vmatprep.mubr.msk.f32.mxu1 %vm227_vm0, %v225_v2  ;;  %1167 = vmatprep.mubr.msk.f32.mxu0 %vm227_vm0, %v1060_v4  ;;  %v1061_v6 = vld [vmem:[%s1693_s29 + $0x18] sm:$0xff]  ;;  %v219_v7 = vld [vmem:[#allocation2] sm:$0xff]  ;;  %v221_v15 = vld [vmem:[#allocation2 + $0x10] sm:$0xff]  ;;  %s948_s4 = sshll.u32 %s1726_s22, 4  ;;  %s1763_s6 = scalar_lea.hbm %s1820_s3, %s1105_s11  ;;  %s1765_s4 = int_to_ptr.vmem [resolvable:$true] %s948_s4 }
  0x75   : > { %1215 = vmatprep.subr.bf16.mxu1 %v1214_v3  ;;  %1223 = vmatprep.subr.bf16.mxu0 %v1214_v3  ;;  %v220_v14 = vld [vmem:[#allocation2 + $0x8] sm:$0xff]  ;;  %v222_v16 = vld [vmem:[#allocation2 + $0x18] sm:$0xff]  ;;  %v1072_v17 = vld [vmem:[%s1693_s29 + $0x20] sm:$0xff]  ;;  %s934_s16 = scalar_lea.sflag [#allocation4], %s1690_s19  ;;  %s1403_s8 = scalar_lea.vmem %s1765_s4, 2048 }
  0x76   : > { %1217 = vmatpush3.bf16.msra.mxu1 %v1214_v3  ;;  %1225 = vmatpush3.bf16.msra.mxu0 %v1214_v3  ;;  %v1084_v18 = vld [vmem:[%s1693_s29 + $0x30] sm:$0xff]  ;;  %v1073_v19 = vld [vmem:[%s1693_s29 + $0x28] sm:$0xff]  ;;  %v1085_v20 = vld [vmem:[%s1693_s29 + $0x38] sm:$0xff]  ;;  %p1404_p10 = scmp.ne.s32.totalorder %s1765_s4, %s1403_s8  ;;  %p1842_p1 = scmp.ne.s32.totalorder %s1828_s24, 0 }
  0x77   : > { %s1484_s9 = smov [#allocation8]  }
  0x78   : > { %p1405_p4 = pnand %p1404_p10, %p1842_p1  ;;  %s1407_s30 = sshll.u32 %s1484_s9, 4  ;;  %s1408_s30 = int_to_ptr.vmem [resolvable:$false] %s1407_s30 }
  0x79   : > { %1151 = vmatmul.mubr.msk.f32.vlgmr.msra.gmra.mrb[0].mxu1 %vm227_vm0, %v226_v5  ;;  %1168 = vmatmul.mubr.msk.f32.vlgmr.msra.gmra.mrb[0].mxu0 %vm227_vm0, %v1061_v6  ;;  %s1409_s7 = scalar_lea.vmem %s1408_s30, 4096  ;;  %p1410_p2 = scmp.lt.s32.totalorder %s1765_s4, %s1408_s30 }
  0x7a   : > { %1157 = vmatprep.mubr.msk.f32.mxu1 %vm227_vm0, %v219_v7  ;;  %1174 = vmatprep.mubr.msk.f32.mxu0 %vm227_vm0, %v219_v7  ;;  %p1406_p0 = pneg %p1405_p4  ;;  %p1411_p5 = scmp.lt.s32.totalorder %s1409_s7, %s1403_s8 }
  0x7c   : > { %p1412_p11 = por %p1411_p5, %p1410_p2 }
  0x7e   : > { %p1413_p12 = pnand %p1412_p11, %p1406_p0 }
 0x14c   : > { %v1152_v8 = vpop.f32.mrb[0].mxu1  ;;  %v1169_v9 = vpop.f32.mrb[0].mxu0 }
 0x14d   : > { %v300_v10 = vpop.f32.mrb[1].mxu1  ;;  %v486_v11 = vpop.f32.mrb[1].mxu0 }
 0x14e   : > { %v1218_v12 = vpack.c.bf16 %v1152_v8, %v300_v10  ;;  %v1226_v13 = vpack.c.bf16 %v1169_v9, %v486_v11 }
 0x150   : > { %1219 = vmatprep.subr.bf16.mxu1 %v1218_v12  ;;  %1227 = vmatprep.subr.bf16.mxu0 %v1226_v13 }
 0x151   : > { %1221 = vmatpush3.bf16.msra.mxu1 %v1218_v12  ;;  %1229 = vmatpush3.bf16.msra.mxu0 %v1226_v13 }
 0x152   : > { %1231 = vmatprep.subr.bf16.mxu1 %v1214_v3  ;;  %1239 = vmatprep.subr.bf16.mxu0 %v1214_v3 }
 0x154   : > { %1158 = vmatmul.mubr.msk.f32.vlgmr.msra.gmra.mrb[2].mxu1 %vm227_vm0, %v220_v14  ;;  %1175 = vmatmul.mubr.msk.f32.vlgmr.msra.gmra.mrb[2].mxu0 %vm227_vm0, %v220_v14 }
 0x155   : > { %1233 = vmatpush3.bf16.msra.mxu1 %v1214_v3  ;;  %1241 = vmatpush3.bf16.msra.mxu0 %v1214_v3 }
 0x156   : > { %1160 = vmatprep.mubr.msk.f32.mxu1 %vm227_vm0, %v221_v15  ;;  %1177 = vmatprep.mubr.msk.f32.mxu0 %vm227_vm0, %v221_v15 }
 0x158   : > { %1161 = vmatmul.mubr.msk.f32.gmra.mrb[4].mxu1 %vm227_vm0, %v222_v16  ;;  %1178 = vmatmul.mubr.msk.f32.gmra.mrb[4].mxu0 %vm227_vm0, %v222_v16 }
 0x159   : > { %1184 = vmatprep.mubr.msk.f32.mxu1 %vm227_vm0, %v1072_v17  ;;  %1201 = vmatprep.mubr.msk.f32.mxu0 %vm227_vm0, %v1084_v18 }
 0x15c   : > { %1185 = vmatmul.mubr.msk.f32.vlgmr.msra.gmra.mrb[6].mxu1 %vm227_vm0, %v1073_v19  ;;  %1202 = vmatmul.mubr.msk.f32.vlgmr.msra.gmra.mrb[6].mxu0 %vm227_vm0, %v1085_v20 }
 0x15d   : > { %1191 = vmatprep.mubr.msk.f32.mxu1 %vm227_vm0, %v219_v7  ;;  %1208 = vmatprep.mubr.msk.f32.mxu0 %vm227_vm0, %v219_v7 }
 0x227   : > { %v1159_v21 = vpop.f32.mrb[2].mxu1  ;;  %v1176_v22 = vpop.f32.mrb[2].mxu0 }
 0x228   : > { %408 = vst.msk [vmem:[%s1726_s22 + $0x8] sm:$0xff] %vm406_vm1, %v1159_v21  ;;  %1069 = vst.msk [vmem:[%s1726_s22 + $0x28] sm:$0xff] %vm406_vm1, %v1176_v22  ;;  %v387_v23 = vpop.f32.mrb[3].mxu1  ;;  %v561_v24 = vpop.f32.mrb[3].mxu0 }
 0x229   : > { %407 = vst.msk [vmem:[%s1726_s22] sm:$0xff] %vm406_vm1, %v387_v23  ;;  %1068 = vst.msk [vmem:[%s1726_s22 + $0x20] sm:$0xff] %vm406_vm1, %v561_v24 }
 0x22b   : > { %v1162_v25 = vpop.f32.mrb[4].mxu1  ;;  %v1179_v26 = vpop.f32.mrb[4].mxu0 }
 0x22c   : > { %410 = vst.msk [vmem:[%s1726_s22 + $0x18] sm:$0xff] %vm406_vm1, %v1162_v25  ;;  %1071 = vst.msk [vmem:[%s1726_s22 + $0x38] sm:$0xff] %vm406_vm1, %v1179_v26  ;;  %v397_v27 = vpop.f32.mrb[5].mxu1  ;;  %v571_v28 = vpop.f32.mrb[5].mxu0 }
 0x22d   : > { %409 = vst.msk [vmem:[%s1726_s22 + $0x10] sm:$0xff] %vm406_vm1, %v397_v27  ;;  %1070 = vst.msk [vmem:[%s1726_s22 + $0x30] sm:$0xff] %vm406_vm1, %v571_v28 }
 0x22f   : > { %v1186_v29 = vpop.f32.mrb[6].mxu1  ;;  %v1203_v30 = vpop.f32.mrb[6].mxu0 }
 0x230   : > { %v660_v31 = vpop.f32.mrb[7].mxu1  ;;  %v834_v32 = vpop.f32.mrb[7].mxu0 }
 0x231   : > { %v1234_v33 = vpack.c.bf16 %v1186_v29, %v660_v31  ;;  %v1242_v34 = vpack.c.bf16 %v1203_v30, %v834_v32 }
 0x233   : > { %1235 = vmatprep.subr.bf16.mxu1 %v1234_v33  ;;  %1243 = vmatprep.subr.bf16.mxu0 %v1242_v34 }
 0x234   : > { %1237 = vmatpush3.bf16.msra.mxu1 %v1234_v33  ;;  %1245 = vmatpush3.bf16.msra.mxu0 %v1242_v34 }
 0x237   : > { %1192 = vmatmul.mubr.msk.f32.vlgmr.msra.gmra.mrb[8].mxu1 %vm227_vm0, %v220_v14  ;;  %1209 = vmatmul.mubr.msk.f32.vlgmr.msra.gmra.mrb[8].mxu0 %vm227_vm0, %v220_v14 }
 0x238   : > { %1194 = vmatprep.mubr.msk.f32.mxu1 %vm227_vm0, %v221_v15  ;;  %1211 = vmatprep.mubr.msk.f32.mxu0 %vm227_vm0, %v221_v15 }
 0x23b   : > { %1195 = vmatmul.mubr.msk.f32.gmra.mrb[10].mxu1 %vm227_vm0, %v222_v16  ;;  %1212 = vmatmul.mubr.msk.f32.gmra.mrb[10].mxu0 %vm227_vm0, %v222_v16 }
 0x30a   : > { %v1193_v35 = vpop.f32.mrb[8].mxu1  ;;  %v1210_v36 = vpop.f32.mrb[8].mxu0 }
 0x30b   : > { %1081 = vst.msk [vmem:[%s1726_s22 + $0x48] sm:$0xff] %vm406_vm1, %v1193_v35  ;;  %1093 = vst.msk [vmem:[%s1726_s22 + $0x68] sm:$0xff] %vm406_vm1, %v1210_v36  ;;  %v735_v37 = vpop.f32.mrb[9].mxu1  ;;  %v909_v38 = vpop.f32.mrb[9].mxu0 }
 0x30c   : > { %1080 = vst.msk [vmem:[%s1726_s22 + $0x40] sm:$0xff] %vm406_vm1, %v735_v37  ;;  %1092 = vst.msk [vmem:[%s1726_s22 + $0x60] sm:$0xff] %vm406_vm1, %v909_v38 }
 0x30e   : > { %v1196_v39 = vpop.f32.mrb[10].mxu1  ;;  %v1213_v40 = vpop.f32.mrb[10].mxu0 }
 0x30f   : > { %1083 = vst.msk [vmem:[%s1726_s22 + $0x58] sm:$0xff] %vm406_vm1, %v1196_v39  ;;  %1095 = vst.msk [vmem:[%s1726_s22 + $0x78] sm:$0xff] %vm406_vm1, %v1213_v40  ;;  %v745_v41 = vpop.f32.mrb[11].mxu1  ;;  %v919_v42 = vpop.f32.mrb[11].mxu0 }
 0x310   : > { %1082 = vst.msk [vmem:[%s1726_s22 + $0x50] sm:$0xff] %vm406_vm1, %v745_v41  ;;  %1094 = vst.msk [vmem:[%s1726_s22 + $0x70] sm:$0xff] %vm406_vm1, %v919_v42 }
 0x311   : > { %1416 = shalt.err (!%p1413_p12)
}
 0x312   : > { %s1417_s10 = scalar_lea.hbm %s1763_s6, 2048  ;;  %s1421_s26 = scalar_lea.hbm %s1820_s3, 4096 }
 0x313   : > { %p1418_p3 = scmp.ne.s32.totalorder %s1763_s6, %s1417_s10  ;;  %p1422_p7 = scmp.lt.u32.totalorder %s1763_s6, %s1820_s3 }
 0x314   : > { %p1423_p9 = scmp.lt.u32.totalorder %s1421_s26, %s1417_s10  ;;  %p1425_p10 = scmp.lt.u32.totalorder %s1417_s10, %s1763_s6 }
 0x315   : > { %p1419_p6 = pnand %p1418_p3, %p1842_p1 }
 0x316   : > { %p1424_p8 = por %p1423_p9, %p1422_p7 }
 0x317   : > { %p1420_p13 = pneg %p1419_p6 }
 0x318   : > { %p1426_p4 = por %p1425_p10, %p1424_p8 }
 0x31a   : > { %p1427_p0 = pnand %p1426_p4, %p1420_p13 }
 0x31c   : > { %1430 = shalt.err (!%p1427_p0)
}
 0x31d   : > { %s1485_s23 = smov 128   ;;  %s1486_s22 = smov 8  }
 0x31e   : > { %1256 = dma.vmem_to_hbm [thread:$0]  (%p1842_p1), %s1765_s4, 2048, %s1763_s6, %s934_s16, %s1485_s23, %s1485_s23, %s1486_s22  }
 0x31f PF: > { %s963_s11 = sand.u32 1, %s1465_s12   ;;  %p1843_p2 = scmp.ne.s32.totalorder %s1829_s25, 0 }
 0x320   : > { %p1844_p5 = scmp.ge.s32.totalorder %s1477_s15, 2  ;;  %s964_s17 = scalar_lea.sflag [#allocation4], %s963_s11 }
 0x322   : > { %p1270_p11 = pnand %p1844_p5, %p1843_p2 }
 0x324   : > { %1460 = dma.done.wait (!%p1270_p11), %s964_s17, 2048  }
 0x325   : > { %1462 = vsyncadd (!%p1270_p11), %s964_s17, 4294965248  ;;  %p15_p12 = scmp.ge.s32.totalorder %s1532_s18, 4   ;;  %s1845_s12 = smov %s1469_s13 }
 0x326   : > { %s1846_s13 = smov %s1473_s14  ;;  %s1847_s14 = smov %s1544_s21 }
 0x327   : > { %s1848_s15 = smov %s1532_s18  ;;  %17 = sbr.rel (!%p15_p12) target bundleno = 5 (0x5), region = 90 }
 0x32e   :  { %969 = vsyncpa [#allocation3], 1 }
 0x32f   :  { %971 = vsyncpa [#allocation3 + $0x1], 1 }
 0x330   :  { %972 = vsyncpa [#allocation6], 1 }
 0x331   :  { %973 = vsyncpa [#allocation4], 1 }
 0x332   :  { %975 = vsyncpa [#allocation4 + $0x1], 1 }

</bundles_post_ra>
